<compile_context>
chip_gen: v7x
topology: tpu7x:2x2x1
jax: 0.10.0
libtpu: 0.0.40
codegen_flags: <defaults>
</compile_context>

<pallas_src>
import functools
import math

import jax
import jax.numpy as jnp
from jax.experimental import pallas as pl
from jax.experimental.pallas import tpu as pltpu


# ----------------------------- tiling helpers ------------------------------

def _round_up(x, m):
    return ((x + m - 1) // m) * m


def _cdiv(a, b):
    return -(-a // b)


def _sublane_multiple(dtype):
    itemsize = jnp.dtype(dtype).itemsize
    if itemsize >= 4:
        return 8
    if itemsize == 2:
        return 16
    return 32


def _pick_row_tile(rows, width, itemsize, sub,
                   target_tile_bytes=2 << 20, row_cap=512, min_grid_steps=8):
    """Row tile targeting ~2 MiB per buffered x tile (measured ~1 MiB already
    hits ~85% of HBM roofline), capped at 512 rows, and additionally capped so
    the grid has >= min_grid_steps steps when rows allow (keeps both v7x
    TensorCores fed via the 'parallel' row axis)."""
    by_bytes = max(sub, target_tile_bytes // max(width * itemsize, 1))
    by_steps = max(sub, _cdiv(rows, min_grid_steps))
    tile = min(by_bytes, by_steps, row_cap, _round_up(rows, sub))
    tile = max(sub, (tile // sub) * sub)
    return tile


def _vmem_limit_bytes(row_tile, width, itemsize):
    """Footprint-derived limit: double-buffered in+out tiles + ~3 f32 working
    temps + tiny resident params.  Floor 32 MiB (above the v5e 16 MiB scoped
    default), cap 48 MiB (safely under v7x's 64 MiB per-TensorCore VMEM even if
    hardware queries report per-chip capacity)."""
    io = 2 * 2 * row_tile * width * itemsize       # x + out, double-buffered
    temps = 3 * row_tile * width * 4               # f32 working set headroom
    params = 2 * 2 * width * 4                     # (2, width) resident params
    needed = io + temps + params + (1 << 20)
    return int(min(max(needed, 32 << 20), 48 << 20))


# --------------------------------- kernels ----------------------------------

def _adaln_kernel(x_ref, p_ref, o_ref, *, eps, inv_d):
    """Unpacked path. x_ref: (TR, D) row tile; p_ref: (2, D) f32 [gamma; beta]."""
    x = x_ref[...].astype(jnp.float32)
    gamma = p_ref[0:1, :]
    beta = p_ref[1:2, :]
    # Single sweep: row sums of x and x*x; biased var = E[x^2] - mean^2 (>= 0).
    mean = jnp.sum(x, axis=-1, keepdims=True) * inv_d
    ex2 = jnp.sum(x * x, axis=-1, keepdims=True) * inv_d
    var = jnp.maximum(ex2 - mean * mean, 0.0)
    inv = jax.lax.rsqrt(var + eps)
    o_ref[...] = ((x - mean) * inv * gamma + beta).astype(o_ref.dtype)


def _adaln_packed_kernel(x_ref, p_ref, seg_ref, o_ref, *, eps, inv_d):
    """Lane-packed path for small D: each physical row holds `pack` logical rows
    (width pack*D, a multiple of 128).  Per-segment sums are computed with a
    small block-diagonal matmul on the MXU so all VPU work and the output store
    stay lane-dense (no masked vst)."""
    x = x_ref[...].astype(jnp.float32)            # (TR, K*D)
    seg = seg_ref[...]                            # (K*D, K*D) block-diag ones, f32
    gamma = p_ref[0:1, :]                         # (1, K*D) tiled gamma
    beta = p_ref[1:2, :]                          # (1, K*D) tiled beta
    sum_x = jnp.dot(x, seg, preferred_element_type=jnp.float32)
    sum_x2 = jnp.dot(x * x, seg, preferred_element_type=jnp.float32)
    mean = sum_x * inv_d
    var = jnp.maximum(sum_x2 * inv_d - mean * mean, 0.0)
    inv = jax.lax.rsqrt(var + eps)
    o_ref[...] = ((x - mean) * inv * gamma + beta).astype(o_ref.dtype)


# --------------------------------- wrapper ----------------------------------

def adaln(x, gamma, beta, eps=1e-6, *, row_tile=None):
    """AdaLN forward. x: (..., D); gamma, beta: (D,)."""
    orig_shape = x.shape
    d = orig_shape[-1]
    x2 = x.reshape(-1, d)
    rows = x2.shape[0]
    sub = _sublane_multiple(x.dtype)
    itemsize = jnp.dtype(x.dtype).itemsize

    gamma_f = gamma.reshape(-1).astype(jnp.float32)
    beta_f = beta.reshape(-1).astype(jnp.float32)
    eps = float(eps)
    inv_d = 1.0 / float(d)

    # ---- lane-dense packed path for small hidden sizes (D < 128) ----
    pack = 1
    if d < 128:
        k = (d * 128 // math.gcd(d, 128)) // d      # lcm(d,128) / d
        if rows % k == 0 and k * d <= 1024:
            pack = k
    if pack > 1:
        kd = pack * d
        p_rows = rows // pack
        xp = x2.reshape(p_rows, kd)                  # contiguous, no copy
        params = jnp.stack([jnp.tile(gamma_f, pack), jnp.tile(beta_f, pack)])
        seg_id = jnp.arange(kd, dtype=jnp.int32) // d
        seg = (seg_id[:, None] == seg_id[None, :]).astype(jnp.float32)

        tile = row_tile if row_tile is not None else _pick_row_tile(
            p_rows, kd, itemsize, sub)
        grid = (pl.cdiv(p_rows, tile),)
        out = pl.pallas_call(
            functools.partial(_adaln_packed_kernel, eps=eps, inv_d=inv_d),
            out_shape=jax.ShapeDtypeStruct((p_rows, kd), x.dtype),
            grid_spec=pltpu.PrefetchScalarGridSpec(
                num_scalar_prefetch=0,
                grid=grid,
                in_specs=[
                    pl.BlockSpec((tile, kd), lambda i: (i, 0)),   # packed rows
                    pl.BlockSpec((2, kd), lambda i: (0, 0)),      # gamma/beta
                    pl.BlockSpec((kd, kd), lambda i: (0, 0)),     # segment matrix
                ],
                out_specs=pl.BlockSpec((tile, kd), lambda i: (i, 0)),
            ),
            compiler_params=pltpu.CompilerParams(
                dimension_semantics=("parallel",),
                vmem_limit_bytes=_vmem_limit_bytes(tile, kd, itemsize),
            ),
        )(xp, params, seg)
        return out.reshape(orig_shape)

    # ---- unpacked streaming path ----
    params = jnp.stack([gamma_f, beta_f])            # (2, D) f32 resident
    tile = row_tile if row_tile is not None else _pick_row_tile(
        rows, d, itemsize, sub)
    grid = (pl.cdiv(rows, tile),)                    # partial last block masked
    out = pl.pallas_call(
        functools.partial(_adaln_kernel, eps=eps, inv_d=inv_d),
        out_shape=jax.ShapeDtypeStruct((rows, d), x.dtype),
        grid_spec=pltpu.PrefetchScalarGridSpec(
            num_scalar_prefetch=0,
            grid=grid,
            in_specs=[
                pl.BlockSpec((tile, d), lambda i: (i, 0)),        # x row tile
                pl.BlockSpec((2, d), lambda i: (0, 0)),           # gamma/beta
            ],
            out_specs=pl.BlockSpec((tile, d), lambda i: (i, 0)),
        ),
        compiler_params=pltpu.CompilerParams(
            dimension_semantics=("parallel",),
            vmem_limit_bytes=_vmem_limit_bytes(tile, d, itemsize),
        ),
    )(x2, params)
    return out.reshape(orig_shape)


# ------------------------------- reference ---------------------------------

def adaln_ref(x, gamma, beta, eps=1e-6):
    """Pure-JAX reference matching the PyTorch forward exactly."""
    mean = jnp.mean(x, axis=-1, keepdims=True)
    var = jnp.mean((x - mean) ** 2, axis=-1, keepdims=True)  # unbiased=False
    x_norm = (x - mean) / jnp.sqrt(var + eps)
    return gamma * x_norm + beta


if __name__ == "__main__":
    key = jax.random.PRNGKey(0)
    k1, k2, k3, k4, k5 = jax.random.split(key, 5)

    # ---- test 1: module-scale demo (batch=2, seq=8, hidden=32) ----
    # D=32 < 128 and rows=16 divisible by pack=4 -> lane-packed MXU path.
    batch, seq, hidden = 2, 8, 32
    x = jax.random.normal(k1, (batch, seq, hidden), dtype=jnp.float32)
    gamma = jnp.ones((hidden,), dtype=jnp.float32)   # as in AdaLN.__init__
    beta = jnp.zeros((hidden,), dtype=jnp.float32)
    out = jax.block_until_ready(adaln(x, gamma, beta))
    ref = adaln_ref(x, gamma, beta)
    assert out.shape == x.shape and out.dtype == x.dtype
    assert jnp.allclose(out, ref, atol=1e-5, rtol=1e-5), "mismatch (test 1)"

    # ---- test 2: rows not packable (15 rows), non-trivial gamma/beta ----
    # Exercises the unpacked path, multi-step grid, and masked partial block.
    x2 = jax.random.normal(k2, (3, 5, hidden), dtype=jnp.float32)
    gamma2 = jax.random.normal(k3, (hidden,), dtype=jnp.float32)
    beta2 = jax.random.normal(k4, (hidden,), dtype=jnp.float32)
    out2 = jax.block_until_ready(adaln(x2, gamma2, beta2))
    ref2 = adaln_ref(x2, gamma2, beta2)
    assert jnp.allclose(out2, ref2, atol=1e-5, rtol=1e-5), "mismatch (test 2)"

    # ---- test 3: lane-dense hidden (multiple of 128), multi-step grid ----
    x3 = jax.random.normal(k5, (4, 16, 256), dtype=jnp.float32)
    gamma3 = jnp.ones((256,), dtype=jnp.float32)
    beta3 = jnp.zeros((256,), dtype=jnp.float32)
    out3 = jax.block_until_ready(adaln(x3, gamma3, beta3))
    ref3 = adaln_ref(x3, gamma3, beta3)
    assert jnp.allclose(out3, ref3, atol=1e-5, rtol=1e-5), "mismatch (test 3)"

    print("KERNEL_OK")
</pallas_src>

<mosaic_0001>
module attributes {stable_mosaic.version = 11 : i64} {
  func.func @_adaln_packed_kernel(%arg0: i32, %arg1: memref<8x128xf32, #tpu.memory_space<vmem>>, %arg2: memref<2x128xf32, #tpu.memory_space<vmem>>, %arg3: memref<128x128xf32, #tpu.memory_space<vmem>>, %arg4: memref<8x128xf32, #tpu.memory_space<vmem>>) attributes {dimension_semantics = [#tpu.dimension_semantics<parallel>], iteration_bounds = array<i64: 1>, scalar_prefetch = 0 : i64, scratch_operands = 0 : i64, tpu.core_type = #tpu.core_type<tc>, window_params = [{transform_indices = @transform_0, window_bounds = array<i64: 8, 128>}, {pipeline_mode = #tpu.pipeline_mode<synchronous>, transform_indices = @transform_1, window_bounds = array<i64: 2, 128>}, {pipeline_mode = #tpu.pipeline_mode<synchronous>, transform_indices = @transform_2, window_bounds = array<i64: 128, 128>}, {transform_indices = @transform_3, window_bounds = array<i64: 8, 128>}]} {
    %c0 = arith.constant 0 : index
    %c0_0 = arith.constant 0 : index
    %0 = vector.load %arg1[%c0, %c0_0] : memref<8x128xf32, #tpu.memory_space<vmem>>, vector<8x128xf32>
    %c0_1 = arith.constant 0 : index
    %c0_2 = arith.constant 0 : index
    %1 = vector.load %arg3[%c0_1, %c0_2] : memref<128x128xf32, #tpu.memory_space<vmem>>, vector<128x128xf32>
    %c0_3 = arith.constant 0 : index
    %c0_4 = arith.constant 0 : index
    %2 = vector.load %arg2[%c0_3, %c0_4] : memref<2x128xf32, #tpu.memory_space<vmem>>, vector<1x128xf32>
    %c1 = arith.constant 1 : index
    %c0_5 = arith.constant 0 : index
    %3 = vector.load %arg2[%c1, %c0_5] : memref<2x128xf32, #tpu.memory_space<vmem>>, vector<1x128xf32>
    %cst = arith.constant dense<0.000000e+00> : vector<8x128xf32>
    %4 = tpu.matmul %0, %1, %cst {dimension_numbers = #tpu.dot_dimension_numbers<[1], [0], [0], [1], [0, 0, 1, 1], [], []>} : vector<8x128xf32>, vector<128x128xf32>, vector<8x128xf32> -> vector<8x128xf32>
    %5 = arith.mulf %0, %0 : vector<8x128xf32>
    %cst_6 = arith.constant dense<0.000000e+00> : vector<8x128xf32>
    %6 = tpu.matmul %5, %1, %cst_6 {dimension_numbers = #tpu.dot_dimension_numbers<[1], [0], [0], [1], [0, 0, 1, 1], [], []>} : vector<8x128xf32>, vector<128x128xf32>, vector<8x128xf32> -> vector<8x128xf32>
    %cst_7 = arith.constant 3.125000e-02 : f32
    %7 = vector.broadcast %cst_7 : f32 to vector<8x128xf32>
    %8 = arith.mulf %4, %7 : vector<8x128xf32>
    %cst_8 = arith.constant 3.125000e-02 : f32
    %9 = vector.broadcast %cst_8 : f32 to vector<8x128xf32>
    %10 = arith.mulf %6, %9 : vector<8x128xf32>
    %11 = arith.mulf %8, %8 : vector<8x128xf32>
    %12 = arith.subf %10, %11 : vector<8x128xf32>
    %cst_9 = arith.constant 0.000000e+00 : f32
    %13 = vector.broadcast %cst_9 : f32 to vector<8x128xf32>
    %14 = arith.maximumf %12, %13 : vector<8x128xf32>
    %cst_10 = arith.constant 9.99999997E-7 : f32
    %15 = vector.broadcast %cst_10 : f32 to vector<8x128xf32>
    %16 = arith.addf %14, %15 : vector<8x128xf32>
    %17 = math.rsqrt %16 : vector<8x128xf32>
    %18 = arith.subf %0, %8 : vector<8x128xf32>
    %19 = arith.mulf %18, %17 : vector<8x128xf32>
    %20 = vector.broadcast %2 : vector<1x128xf32> to vector<8x128xf32>
    %21 = arith.mulf %19, %20 : vector<8x128xf32>
    %22 = vector.broadcast %3 : vector<1x128xf32> to vector<8x128xf32>
    %23 = arith.addf %21, %22 : vector<8x128xf32>
    %c0_11 = arith.constant 0 : index
    %c0_12 = arith.constant 0 : index
    %24 = vector.load %arg4[%c0_11, %c0_12] : memref<8x128xf32, #tpu.memory_space<vmem>>, vector<8x128xf32>
    tpu.vector_store %arg4[%c0_11, %c0_12], %23 {strides = array<i32>} : memref<8x128xf32, #tpu.memory_space<vmem>>, vector<8x128xf32>,
    return
  }
  func.func @transform_0(%arg0: i32) -> (i32, i32) {
    %c0_i32 = arith.constant 0 : i32
    %c0_i32_0 = arith.constant 0 : i32
    return %arg0, %c0_i32 : i32, i32
  }
  func.func @transform_1(%arg0: i32) -> (i32, i32) {
    %c0_i32 = arith.constant 0 : i32
    %c0_i32_0 = arith.constant 0 : i32
    %c0_i32_1 = arith.constant 0 : i32
    return %c0_i32, %c0_i32_0 : i32, i32
  }
  func.func @transform_2(%arg0: i32) -> (i32, i32) {
    %c0_i32 = arith.constant 0 : i32
    %c0_i32_0 = arith.constant 0 : i32
    %c0_i32_1 = arith.constant 0 : i32
    return %c0_i32, %c0_i32_0 : i32, i32
  }
  func.func @transform_3(%arg0: i32) -> (i32, i32) {
    %c0_i32 = arith.constant 0 : i32
    %c0_i32_0 = arith.constant 0 : i32
    return %arg0, %c0_i32 : i32, i32
  }
}

</mosaic_0001>

<bundles_post_ra>
// kernel: tpu_custom_call.1
= control target key start
LH: loop header
LB: loop body
LE: loop exit
PB: predicated region body
PF: predicated region fallthrough
CT: control target
= control target key end

     0   :  { %8 = vsyncpa [#allocation3], 0  ;;  %s557_s0 = inlined_call_operand.hbm [shape: f32[4,128], index: 0, kind: input, shape index: {}]   ;;  %s558_s1 = inlined_call_operand.vmem [shape: f32[2,128], index: 1, kind: input, shape index: {}]   ;;  %s559_s2 = inlined_call_operand.hbm [shape: f32[128,128], index: 2, kind: input, shape index: {}]   ;;  %s560_s3 = inlined_call_operand.hbm [shape: f32[4,128], index: 3, kind: output, shape index: {}]  }
   0x1   :  { %9 = vsyncpa [#allocation6], 0 }
   0x2   :  { %10 = vsyncpa [#allocation4], 0 }
   0x3   :  { %15 = vsyncadd [#allocation3], 64  ;;  %s479_s12 = smov [#allocation2]   ;;  %s407_s16 = scalar_lea.hbm %s557_s0, 64 }
   0x4   :  { %s16_s13 = sshll.u32 %s479_s12, 4  ;;  %p408_p0 = scmp.ne.s32.totalorder %s557_s0, %s407_s16  ;;  %s17_s13 = int_to_ptr.vmem [resolvable:$true] %s16_s13 }
   0x5   :  { %p411_p1 = scmp.lt.u32.totalorder %s407_s16, %s557_s0 }
   0x7   :  { %p413_p2 = pnand %p411_p1, %p408_p0 }
   0x9   :  { %416 = shalt.err (!%p413_p2)
}
   0xa   :  { %s417_s21 = scalar_lea.vmem %s17_s13, 64  ;;  %s421_s22 = scalar_lea.vmem %s17_s13, 128 }
   0xb   :  { %p418_p3 = scmp.ne.s32.totalorder %s17_s13, %s417_s21  ;;  %p422_p4 = scmp.lt.s32.totalorder %s17_s13, %s17_s13 }
   0xc   :  { %p423_p5 = scmp.lt.s32.totalorder %s421_s22, %s417_s21 }
   0xe   :  { %p424_p6 = por %p423_p5, %p422_p4 }
  0x10   :  { %p425_p7 = pnand %p424_p6, %p418_p3 }
  0x12   :  { %428 = shalt.err (!%p425_p7)
}
  0x13   :  { %s480_s23 = smov 64   ;;  %s481_s24 = smov 4  }
  0x14   :  { %22 = dma.hbm_to_vmem [thread:$0]  %s557_s0, 64, %s17_s13, [#allocation3], %s480_s23, %s480_s23, %s481_s24  }
  0x15   :  { %s482_s27 = smov [#allocation5]   ;;  %s429_s4 = scalar_lea.hbm %s559_s2, 2048 }
  0x16   :  { %s30_s28 = sshll.u32 %s482_s27, 4  ;;  %p430_p8 = scmp.ne.s32.totalorder %s559_s2, %s429_s4  ;;  %s31_s28 = int_to_ptr.vmem [resolvable:$true] %s30_s28 }
  0x17   :  { %p433_p9 = scmp.lt.u32.totalorder %s429_s4, %s559_s2 }
  0x19   :  { %p435_p10 = pnand %p433_p9, %p430_p8 }
  0x1b   :  { %438 = shalt.err (!%p435_p10)
}
  0x1c   :  { %s439_s9 = scalar_lea.vmem %s31_s28, 2048  ;;  %p444_p12 = scmp.lt.s32.totalorder %s31_s28, %s31_s28 }
  0x1d   :  { %p440_p11 = scmp.ne.s32.totalorder %s31_s28, %s439_s9  ;;  %p445_p13 = scmp.lt.s32.totalorder %s439_s9, %s439_s9 }
  0x1f   :  { %p446_p0 = por %p445_p13, %p444_p12 }
  0x21   :  { %p447_p1 = pnand %p446_p0, %p440_p11 }
  0x23   :  { %450 = shalt.err (!%p447_p1)
}
  0x24   :  { %s483_s0 = smov 128   ;;  %s484_s10 = smov 8  }
  0x25   :  { %36 = dma.hbm_to_vmem [thread:$0]  %s559_s2, 2048, %s31_s28, [#allocation6], %s483_s0, %s483_s0, %s484_s10  }
  0x26   :  { %473 = dma.done.wait [#allocation3], 128  }
  0x27   :  { %474 = vsyncadd [#allocation3], 4294967168 }
  0x28   :  { %475 = dma.done.wait [#allocation6], 2048  }
  0x29   :  { %476 = vsyncadd [#allocation6], 4294965248  ;;  %v485_v0 = vmov 0.0|0.0   ;;  %vm486_vm0 = vmmov 0   ;;  %v487_v1 = vmov 0.0   ;;  %v44_v2 = vld [vmem:[#allocation5] sm:$0xff] }
  0x2a   :  { %347 = vmatprep.subr.bf16.mxu0 %v485_v0  ;;  %371 = vmatprep.subr.bf16.mxu1 %v485_v0  ;;  %v45_v3 = vld [vmem:[#allocation5 + $0x8] sm:$0xff]  ;;  %v46_v4 = vld [vmem:[#allocation5 + $0x10] sm:$0xff]  ;;  %v47_v6 = vld [vmem:[#allocation5 + $0x18] sm:$0xff] }
  0x2b   :  { %309 = vmatprep.mubr.msk.f32.mxu0 %vm486_vm0, %v487_v1  ;;  %344 = vmatprep.mubr.msk.f32.mxu1 %vm486_vm0, %v487_v1  ;;  %v348_v5 = vpack.c.bf16 %v45_v3, %v44_v2  ;;  %v351_v7 = vpack.c.bf16 %v47_v6, %v46_v4  ;;  %v48_v8 = vld [vmem:[#allocation5 + $0x20] sm:$0xff]  ;;  %v49_v9 = vld [vmem:[#allocation5 + $0x28] sm:$0xff]  ;;  %v50_v11 = vld [vmem:[#allocation5 + $0x30] sm:$0xff] }
  0x2c   :  { %v354_v10 = vpack.c.bf16 %v49_v9, %v48_v8  ;;  %v51_v12 = vld [vmem:[#allocation5 + $0x38] sm:$0xff]  ;;  %v52_v14 = vld [vmem:[#allocation5 + $0x40] sm:$0xff]  ;;  %v53_v15 = vld [vmem:[#allocation5 + $0x48] sm:$0xff] }
  0x2d   :  { %349 = vmatpush3.bf16.msra.mxu0 %v348_v5  ;;  %373 = vmatpush3.bf16.msra.mxu1 %v348_v5  ;;  %v357_v13 = vpack.c.bf16 %v51_v12, %v50_v11  ;;  %v360_v16 = vpack.c.bf16 %v53_v15, %v52_v14  ;;  %v54_v17 = vld [vmem:[#allocation5 + $0x50] sm:$0xff]  ;;  %v55_v18 = vld [vmem:[#allocation5 + $0x58] sm:$0xff]  ;;  %v56_v20 = vld [vmem:[#allocation5 + $0x60] sm:$0xff] }
  0x2e   :  { %350 = vmatprep.subr.bf16.mxu0 %v485_v0  ;;  %374 = vmatprep.subr.bf16.mxu1 %v485_v0  ;;  %v363_v19 = vpack.c.bf16 %v55_v18, %v54_v17  ;;  %v57_v21 = vld [vmem:[#allocation5 + $0x68] sm:$0xff]  ;;  %v58_v23 = vld [vmem:[#allocation5 + $0x70] sm:$0xff]  ;;  %v59_v24 = vld [vmem:[#allocation5 + $0x78] sm:$0xff] }
  0x2f   :  { %v366_v22 = vpack.c.bf16 %v57_v21, %v56_v20  ;;  %v369_v25 = vpack.c.bf16 %v59_v24, %v58_v23  ;;  %v43_v26 = vld [vmem:[#allocation2] sm:$0xff] }
  0x30   :  { %v132_v27 = vmul.f32 %v43_v26, %v43_v26  ;;  %v241_v40 = vld [vmem:[%s558_s1] ss:$0 sm:$0xff]  ;;  %v242_v42 = vld [vmem:[%s558_s1 + $0x1] ss:$0 sm:$0xff] }
  0x31   :  { %352 = vmatpush3.bf16.msra.mxu0 %v351_v7  ;;  %376 = vmatpush3.bf16.msra.mxu1 %v351_v7 }
  0x32   :  { %353 = vmatprep.subr.bf16.mxu0 %v485_v0  ;;  %377 = vmatprep.subr.bf16.mxu1 %v485_v0 }
  0x35   :  { %355 = vmatpush3.bf16.msra.mxu0 %v354_v10  ;;  %379 = vmatpush3.bf16.msra.mxu1 %v354_v10 }
  0x36   :  { %356 = vmatprep.subr.bf16.mxu0 %v485_v0  ;;  %380 = vmatprep.subr.bf16.mxu1 %v485_v0 }
  0x39   :  { %358 = vmatpush3.bf16.msra.mxu0 %v357_v13  ;;  %382 = vmatpush3.bf16.msra.mxu1 %v357_v13 }
  0x3a   :  { %359 = vmatprep.subr.bf16.mxu0 %v485_v0  ;;  %383 = vmatprep.subr.bf16.mxu1 %v485_v0 }
  0x3d   :  { %361 = vmatpush3.bf16.msra.mxu0 %v360_v16  ;;  %385 = vmatpush3.bf16.msra.mxu1 %v360_v16 }
  0x3e   :  { %362 = vmatprep.subr.bf16.mxu0 %v485_v0  ;;  %386 = vmatprep.subr.bf16.mxu1 %v485_v0 }
  0x41   :  { %364 = vmatpush3.bf16.msra.mxu0 %v363_v19  ;;  %388 = vmatpush3.bf16.msra.mxu1 %v363_v19 }
  0x42   :  { %365 = vmatprep.subr.bf16.mxu0 %v485_v0  ;;  %389 = vmatprep.subr.bf16.mxu1 %v485_v0 }
  0x45   :  { %367 = vmatpush3.bf16.msra.mxu0 %v366_v22  ;;  %391 = vmatpush3.bf16.msra.mxu1 %v366_v22 }
  0x46   :  { %368 = vmatprep.subr.bf16.mxu0 %v485_v0  ;;  %392 = vmatprep.subr.bf16.mxu1 %v485_v0 }
  0x49   :  { %370 = vmatpush3.bf16.msra.mxu0 %v369_v25  ;;  %394 = vmatpush3.bf16.msra.mxu1 %v369_v25 }
  0x4c   :  { %310 = vmatmul.mubr.f32.vlgmr.msra.gmra.mrb[0].mxu0 %v43_v26  ;;  %345 = vmatmul.mubr.f32.vlgmr.msra.gmra.mrb[0].mxu1 %v132_v27 }
 0x11f   :  { %v128_v28 = vpop.f32.mrb[0].mxu0  ;;  %v199_v29 = vpop.f32.mrb[0].mxu1 }
 0x120   :  { %v203_v30 = vmul.f32 0.03125, %v128_v28  ;;  %v311_v31 = vpop.f32.mrb[1].mxu0  ;;  %v204_v32 = vmul.f32 0.03125, %v199_v29  ;;  %v346_v33 = vpop.f32.mrb[1].mxu1 }
 0x122   :  { %v205_v34 = vmul.f32 %v203_v30, %v203_v30  ;;  %v210_v38 = vsub.f32 %v43_v26, %v203_v30 }
 0x124   :  { %v206_v35 = vsub.f32 %v204_v32, %v205_v34 }
 0x126   :  { %v207_v36 = vmax.f32 %v206_v35, 0.0 }
 0x128   :  { %v208_v37 = vadd.f32 1e-06, %v207_v36 }
 0x12a   :  { %405 = vrsqrt.f32 %v208_v37 }
 0x134   :  { %v406_v39 = vpop.eup %405 }
 0x135   :  { %v211_v41 = vmul.f32 %v406_v39, %v210_v38 }
 0x137   :  { %v216_v43 = vmul.f32 %v241_v40, %v211_v41 }
 0x139   :  { %v221_v44 = vadd.f32 %v242_v42, %v216_v43 }
 0x13b   :  { %222 = vst [vmem:[#allocation7] sm:$0xff] %v221_v44 }
 0x13c   :  { %227 = vsyncadd [#allocation4], 64  ;;  %s488_s16 = smov [#allocation7]  }
 0x13d   :  { %s228_s17 = sshll.u32 %s488_s16, 4  ;;  %s229_s17 = int_to_ptr.vmem [resolvable:$true] %s228_s17 }
 0x13e   :  { %s451_s18 = scalar_lea.vmem %s229_s17, 64  ;;  %s455_s19 = scalar_lea.vmem %s229_s17, 128 }
 0x13f   :  { %p452_p2 = scmp.ne.s32.totalorder %s229_s17, %s451_s18  ;;  %p456_p3 = scmp.lt.s32.totalorder %s229_s17, %s229_s17 }
 0x140   :  { %p457_p4 = scmp.lt.s32.totalorder %s455_s19, %s451_s18 }
 0x142   :  { %p458_p5 = por %p457_p4, %p456_p3 }
 0x144   :  { %p459_p6 = pnand %p458_p5, %p452_p2 }
 0x146   :  { %462 = shalt.err (!%p459_p6)
}
 0x147   :  { %s463_s22 = scalar_lea.hbm %s560_s3, 64 }
 0x148   :  { %p464_p7 = scmp.ne.s32.totalorder %s560_s3, %s463_s22  ;;  %p467_p8 = scmp.lt.u32.totalorder %s463_s22, %s560_s3 }
 0x14a   :  { %p469_p9 = pnand %p467_p8, %p464_p7 }
 0x14c   :  { %472 = shalt.err (!%p469_p9)
}
 0x14d   :  { %234 = dma.vmem_to_hbm [thread:$0]  %s229_s17, 64, %s560_s3, [#allocation4], %s480_s23, %s480_s23, %s481_s24  }
 0x14e   :  { %477 = dma.done.wait [#allocation4], 128  }
 0x14f   :  { %478 = vsyncadd [#allocation4], 4294967168 }
 0x150   :  { %238 = vsyncpa [#allocation3], 1 }
 0x151   :  { %239 = vsyncpa [#allocation6], 1 }
 0x152   :  { %240 = vsyncpa [#allocation4], 1 }

</bundles_post_ra>
